<compile_context>
chip_gen: v5e
topology: v5e:2x2
jax: 0.10.0
libtpu: 0.0.40
codegen_flags: <defaults>
</compile_context>

<pallas_src>
import functools

import jax
import jax.numpy as jnp
import numpy as np
from jax import lax
from jax.experimental import pallas as pl
from jax.experimental.pallas import tpu as pltpu


def _maybe_cast(x, dtype):
    return x if dtype is None else x.astype(dtype)


def _mm(matmul_dtype):
    def mm(a, b):
        return jnp.dot(_maybe_cast(a, matmul_dtype), _maybe_cast(b, matmul_dtype),
                       preferred_element_type=jnp.float32)
    return mm


# --------------------------------------------------------------------------- #
# Pass 1: accumulate per-head kv = k^T v over N tiles into the output ref.
# --------------------------------------------------------------------------- #
def _kv_accumulate(xk, xv, wk_ref, bk_ref, wv_ref, bv_ref, kv_ref,
                   *, h, d_k, d_v, matmul_dtype):
    mm = _mm(matmul_dtype)
    k_all = mm(xk, wk_ref[...]) + bk_ref[...]          # (bn, h*d_k)  f32
    v_all = mm(xv, wv_ref[...]) + bv_ref[...]          # (bn, h*d_v)  f32
    k_all = _maybe_cast(k_all, matmul_dtype)
    v_all = _maybe_cast(v_all, matmul_dtype)
    k_all_t = k_all.T                                  # ONE hoisted XLU transpose for all heads
    for hi in range(h):                                # h is a small static constant -> unrolled
        kv_ref[0, hi * d_k:(hi + 1) * d_k, :] += jnp.dot(
            k_all_t[hi * d_k:(hi + 1) * d_k, :],       # (d_k, bn)
            v_all[:, hi * d_v:(hi + 1) * d_v],         # (bn, d_v)
            preferred_element_type=jnp.float32)        # f32 accumulate in the output ref


def _kv_kernel_self(x_ref, wk_ref, bk_ref, wv_ref, bv_ref, kv_ref,
                    *, h, d_k, d_v, matmul_dtype):
    @pl.when(pl.program_id(1) == 0)
    def _():
        kv_ref[...] = jnp.zeros_like(kv_ref)
    x = x_ref[0]                                       # shared K/V activation (self-attn)
    _kv_accumulate(x, x, wk_ref, bk_ref, wv_ref, bv_ref, kv_ref,
                   h=h, d_k=d_k, d_v=d_v, matmul_dtype=matmul_dtype)


def _kv_kernel_cross(xk_ref, xv_ref, wk_ref, bk_ref, wv_ref, bv_ref, kv_ref,
                     *, h, d_k, d_v, matmul_dtype):
    @pl.when(pl.program_id(1) == 0)
    def _():
        kv_ref[...] = jnp.zeros_like(kv_ref)
    _kv_accumulate(xk_ref[0], xv_ref[0], wk_ref, bk_ref, wv_ref, bv_ref, kv_ref,
                   h=h, d_k=d_k, d_v=d_v, matmul_dtype=matmul_dtype)


# --------------------------------------------------------------------------- #
# Pass 2: q projection, XNorm, q_n @ kv_n, fused fc_o -- one output tile / step.
# --------------------------------------------------------------------------- #
def _out_kernel(xq_ref, kv_ref, wq_ref, bq_ref, wo_ref, bo_ref, gamma_ref, out_ref,
                *, h, d_k, d_v, matmul_dtype):
    mm = _mm(matmul_dtype)
    q_all = mm(xq_ref[0], wq_ref[...]) + bq_ref[...]   # (bn, h*d_k)  f32
    acc = None
    for hi in range(h):
        g = gamma_ref[hi]                              # scalar from SMEM
        q = q_all[:, hi * d_k:(hi + 1) * d_k]          # (bn, d_k)
        kv = kv_ref[0, hi * d_k:(hi + 1) * d_k, :]     # (d_k, d_v)  f32
        # XNorm(x, gamma) = x * gamma / ||x||_2  ==  x * (gamma * rsqrt(sum x^2))
        q_n = q * (g * lax.rsqrt(jnp.sum(q * q, axis=-1, keepdims=True)))
        kv_n = kv * (g * lax.rsqrt(jnp.sum(kv * kv, axis=-1, keepdims=True)))
        o_h = mm(q_n, kv_n)                            # (bn, d_v)
        # fc_o fused per head: no concat, no (bn, h*d_v) intermediate.
        contrib = mm(o_h, wo_ref[hi * d_v:(hi + 1) * d_v, :])
        acc = contrib if acc is None else acc + contrib
    out_ref[0] = (acc + bo_ref[...]).astype(out_ref.dtype)   # lane-dense single store


# --------------------------------------------------------------------------- #
# Wrapper
# --------------------------------------------------------------------------- #
def ufo_attention(queries, keys=None, values=None, *, params,
                  matmul_dtype=jnp.bfloat16, block_n=256):
    """UFOAttention.forward. keys/values default to queries (self-attention).

    matmul_dtype: operand dtype for MXU matmuls (f32 accumulation). bfloat16 is
    the production default; pass None for exact f32 operands.
    """
    if keys is None:
        keys = queries
    if values is None:
        values = keys
    kv_same_input = keys is values

    B, Nq, d_model = queries.shape
    Bk, Nk, dmk = keys.shape
    Bv, Nv, dmv = values.shape
    assert (Bk, dmk) == (B, d_model) and (Bv, dmv) == (B, d_model)
    assert Nk == Nv, "keys and values must share a sequence length"

    wq, bq = params["wq"], params["bq"]
    wk, bk = params["wk"], params["bk"]
    wv, bv = params["wv"], params["bv"]
    wo, bo = params["wo"], params["bo"]
    gamma = params["gamma"]
    h = gamma.shape[0]
    d_k = wq.shape[1] // h
    d_v = wv.shape[1] // h

    bn_kv = min(block_n, Nk)
    bn_q = min(block_n, Nq)
    assert Nk % bn_kv == 0 and Nq % bn_q == 0, "sequence length must divide block_n"

    def const2d(arr):      # whole-array block, constant index -> DMA'd once
        return pl.BlockSpec(arr.shape, lambda b, n: (0, 0))

    smem_spec = pl.BlockSpec(memory_space=pltpu.MemorySpace.SMEM)

    def cparams(sem):
        return pltpu.CompilerParams(dimension_semantics=sem,
                                    vmem_limit_bytes=64 * 1024 * 1024)

    f32b = 4  # all HBM tensors here are f32

    # ------------------ pass 1: kv builder ------------------ #
    k_spec = pl.BlockSpec((1, bn_kv, d_model), lambda b, n: (b, n, 0))
    kv_out_spec = pl.BlockSpec((1, h * d_k, d_v), lambda b, n: (b, 0, 0))
    kv_weight_args = (wk, bk, wv, bv)
    kv_weight_specs = [const2d(wk), const2d(bk), const2d(wv), const2d(bv)]

    flops_kv = 2 * B * Nk * h * (d_model * (d_k + d_v) + d_k * d_v)
    bytes_kv = f32b * (B * Nk * d_model * (1 if kv_same_input else 2)
                       + wk.size + bk.size + wv.size + bv.size
                       + B * h * d_k * d_v)

    if kv_same_input:
        kv_kernel = functools.partial(_kv_kernel_self, h=h, d_k=d_k, d_v=d_v,
                                      matmul_dtype=matmul_dtype)
        kv_inputs = (keys,) + kv_weight_args
        kv_in_specs = [k_spec] + kv_weight_specs
    else:
        kv_kernel = functools.partial(_kv_kernel_cross, h=h, d_k=d_k, d_v=d_v,
                                      matmul_dtype=matmul_dtype)
        kv_inputs = (keys, values) + kv_weight_args
        kv_in_specs = [k_spec, k_spec] + kv_weight_specs

    kv = pl.pallas_call(
        kv_kernel,
        out_shape=jax.ShapeDtypeStruct((B, h * d_k, d_v), jnp.float32),
        grid_spec=pltpu.PrefetchScalarGridSpec(
            num_scalar_prefetch=0,
            grid=(B, Nk // bn_kv),
            in_specs=kv_in_specs,
            out_specs=kv_out_spec),
        compiler_params=cparams(("parallel", "arbitrary")),
        cost_estimate=pl.CostEstimate(flops=flops_kv, transcendentals=0,
                                      bytes_accessed=bytes_kv),
    )(*kv_inputs)

    # ------------------ pass 2: output ------------------ #
    q_spec = pl.BlockSpec((1, bn_q, d_model), lambda b, n: (b, n, 0))
    kv_in_spec = pl.BlockSpec((1, h * d_k, d_v), lambda b, n: (b, 0, 0))
    out_spec = pl.BlockSpec((1, bn_q, d_model), lambda b, n: (b, n, 0))

    flops_out = 2 * B * Nq * h * (d_model * d_k + d_k * d_v + d_v * d_model)
    bytes_out = f32b * (B * Nq * d_model * 2 + B * h * d_k * d_v
                        + wq.size + bq.size + wo.size + bo.size + gamma.size)
    transc = B * h * (Nq + d_k)   # one rsqrt per normalized row

    out_kernel = functools.partial(_out_kernel, h=h, d_k=d_k, d_v=d_v,
                                   matmul_dtype=matmul_dtype)
    return pl.pallas_call(
        out_kernel,
        out_shape=jax.ShapeDtypeStruct((B, Nq, d_model), jnp.float32),
        grid_spec=pltpu.PrefetchScalarGridSpec(
            num_scalar_prefetch=0,
            grid=(B, Nq // bn_q),
            in_specs=[q_spec, kv_in_spec, const2d(wq), const2d(bq),
                      const2d(wo), const2d(bo), smem_spec],
            out_specs=out_spec),
        compiler_params=cparams(("parallel", "parallel")),
        cost_estimate=pl.CostEstimate(flops=flops_out, transcendentals=transc,
                                      bytes_accessed=bytes_out),
    )(queries, kv, wq, bq, wo, bo, gamma)


# --------------------------------------------------------------------------- #
# Pure-JAX reference (matches the PyTorch forward exactly)
# --------------------------------------------------------------------------- #
def ufo_reference(queries, keys, values, params, h, d_k, d_v):
    B, N, d_model = queries.shape
    q = queries @ params["wq"] + params["bq"]               # (B, N, h*d_k)
    k = keys @ params["wk"] + params["bk"]                  # (B, N, h*d_k)
    v = values @ params["wv"] + params["bv"]                # (B, N, h*d_v)

    q = q.reshape(B, N, h, d_k).transpose(0, 2, 1, 3)       # (B, h, N, d_k)
    kT = k.reshape(B, N, h, d_k).transpose(0, 2, 3, 1)      # (B, h, d_k, N)
    v = v.reshape(B, N, h, d_v).transpose(0, 2, 1, 3)       # (B, h, N, d_v)

    kv = jnp.matmul(kT, v)                                  # (B, h, d_k, d_v)
    g = params["gamma"].reshape(1, h, 1, 1)
    kv_norm = kv * g / jnp.linalg.norm(kv, axis=-1, keepdims=True)
    q_norm = q * g / jnp.linalg.norm(q, axis=-1, keepdims=True)

    out = jnp.matmul(q_norm, kv_norm)                       # (B, h, N, d_v)
    out = out.transpose(0, 2, 1, 3).reshape(B, N, h * d_v)
    return out @ params["wo"] + params["bo"].reshape(d_model)


def make_params(key, d_model, d_k, d_v, h):
    ks = jax.random.split(key, 9)
    w_std, b_std = 0.001, 0.001   # small random biases so bias handling is actually tested
    return {
        "wq": jax.random.normal(ks[0], (d_model, h * d_k), jnp.float32) * w_std,
        "bq": jax.random.normal(ks[1], (1, h * d_k), jnp.float32) * b_std,
        "wk": jax.random.normal(ks[2], (d_model, h * d_k), jnp.float32) * w_std,
        "bk": jax.random.normal(ks[3], (1, h * d_k), jnp.float32) * b_std,
        "wv": jax.random.normal(ks[4], (d_model, h * d_v), jnp.float32) * w_std,
        "bv": jax.random.normal(ks[5], (1, h * d_v), jnp.float32) * b_std,
        "wo": jax.random.normal(ks[6], (h * d_v, d_model), jnp.float32) * w_std,
        "bo": jax.random.normal(ks[7], (1, d_model), jnp.float32) * b_std,
        "gamma": jax.random.normal(ks[8], (h,), jnp.float32),
    }


if __name__ == "__main__":
    # Lane-dense shapes; N=256 with block_n=128 exercises the tiled kv reduction
    # (grid n-axis = 2) and the tiled output pass.
    B, N, d_model, h = 2, 256, 128, 2
    d_k = d_v = d_model  # module defaults: d_k = d_v = d_model

    root = jax.random.PRNGKey(0)
    k_param, k_x = jax.random.split(root)
    params = make_params(k_param, d_model, d_k, d_v, h)
    x = jax.random.normal(k_x, (B, N, d_model), jnp.float32)

    ref = ufo_reference(x, x, x, params, h, d_k, d_v)

    # 1) exact f32-operand path -> tight check against the reference.
    out_f32 = ufo_attention(x, params=params, matmul_dtype=None, block_n=128)
    out_f32 = jax.block_until_ready(out_f32)
    np.testing.assert_allclose(np.asarray(out_f32), np.asarray(ref),
                               rtol=2e-3, atol=3e-5)

    # 2) production default: bf16 MXU operands, f32 accumulation -> loose check.
    out_bf16 = ufo_attention(x, params=params, block_n=128)
    out_bf16 = jax.block_until_ready(out_bf16)
    np.testing.assert_allclose(np.asarray(out_bf16), np.asarray(ref),
                               rtol=5e-2, atol=5e-4)

    print("KERNEL_OK")
</pallas_src>

<mosaic_0001>
module attributes {stable_mosaic.version = 11 : i64} {
  func.func @_kv_kernel_self(%arg0: i32, %arg1: i32, %arg2: memref<1x128x128xf32, #tpu.memory_space<vmem>>, %arg3: memref<128x256xf32, #tpu.memory_space<vmem>>, %arg4: memref<1x256xf32, #tpu.memory_space<vmem>>, %arg5: memref<128x256xf32, #tpu.memory_space<vmem>>, %arg6: memref<1x256xf32, #tpu.memory_space<vmem>>, %arg7: memref<1x256x128xf32, #tpu.memory_space<vmem>>) attributes {dimension_semantics = [#tpu.dimension_semantics<parallel>, #tpu.dimension_semantics<arbitrary>], iteration_bounds = array<i64: 2, 2>, scalar_prefetch = 0 : i64, scratch_operands = 0 : i64, tpu.core_type = #tpu.core_type<tc>, window_params = [{transform_indices = @transform_0, window_bounds = array<i64: 1, 128, 128>}, {pipeline_mode = #tpu.pipeline_mode<synchronous>, transform_indices = @transform_1, window_bounds = array<i64: 128, 256>}, {pipeline_mode = #tpu.pipeline_mode<synchronous>, transform_indices = @transform_2, window_bounds = array<i64: 1, 256>}, {pipeline_mode = #tpu.pipeline_mode<synchronous>, transform_indices = @transform_3, window_bounds = array<i64: 128, 256>}, {pipeline_mode = #tpu.pipeline_mode<synchronous>, transform_indices = @transform_4, window_bounds = array<i64: 1, 256>}, {transform_indices = @transform_5, window_bounds = array<i64: 1, 256, 128>}]} {
    %c0_i32 = arith.constant 0 : i32
    %0 = arith.cmpi eq, %arg1, %c0_i32 : i32
    %1 = arith.extui %0 : i1 to i32
    %c0_i32_0 = arith.constant 0 : i32
    %2 = arith.cmpi ne, %1, %c0_i32_0 : i32
    scf.if %2 {
      %cst_25 = arith.constant 0.000000e+00 : f32
      %34 = vector.broadcast %cst_25 : f32 to vector<1x256x128xf32>
      %c0_26 = arith.constant 0 : index
      %c0_27 = arith.constant 0 : index
      %c0_28 = arith.constant 0 : index
      %35 = vector.load %arg7[%c0_26, %c0_27, %c0_28] : memref<1x256x128xf32, #tpu.memory_space<vmem>>, vector<1x256x128xf32>
      tpu.vector_store %arg7[%c0_26, %c0_27, %c0_28], %34 {strides = array<i32>} : memref<1x256x128xf32, #tpu.memory_space<vmem>>, vector<1x256x128xf32>,
    } else {
    }
    %c0 = arith.constant 0 : index
    %c0_1 = arith.constant 0 : index
    %c0_2 = arith.constant 0 : index
    %3 = vector.load %arg2[%c0, %c0_1, %c0_2] : memref<1x128x128xf32, #tpu.memory_space<vmem>>, vector<1x128x128xf32>
    %4 = vector.shape_cast %3 : vector<1x128x128xf32> to vector<128x128xf32>
    %c0_3 = arith.constant 0 : index
    %c0_4 = arith.constant 0 : index
    %5 = vector.load %arg3[%c0_3, %c0_4] : memref<128x256xf32, #tpu.memory_space<vmem>>, vector<128x256xf32>
    %cst = arith.constant dense<0.000000e+00> : vector<128x256xf32>
    %6 = tpu.matmul %4, %5, %cst {dimension_numbers = #tpu.dot_dimension_numbers<[1], [0], [0], [1], [0, 0, 1, 1], [], []>} : vector<128x128xf32>, vector<128x256xf32>, vector<128x256xf32> -> vector<128x256xf32>
    %c0_5 = arith.constant 0 : index
    %c0_6 = arith.constant 0 : index
    %7 = vector.load %arg4[%c0_5, %c0_6] : memref<1x256xf32, #tpu.memory_space<vmem>>, vector<1x256xf32>
    %8 = vector.broadcast %7 : vector<1x256xf32> to vector<128x256xf32>
    %9 = arith.addf %6, %8 : vector<128x256xf32>
    %c0_7 = arith.constant 0 : index
    %c0_8 = arith.constant 0 : index
    %10 = vector.load %arg5[%c0_7, %c0_8] : memref<128x256xf32, #tpu.memory_space<vmem>>, vector<128x256xf32>
    %cst_9 = arith.constant dense<0.000000e+00> : vector<128x256xf32>
    %11 = tpu.matmul %4, %10, %cst_9 {dimension_numbers = #tpu.dot_dimension_numbers<[1], [0], [0], [1], [0, 0, 1, 1], [], []>} : vector<128x128xf32>, vector<128x256xf32>, vector<128x256xf32> -> vector<128x256xf32>
    %c0_10 = arith.constant 0 : index
    %c0_11 = arith.constant 0 : index
    %12 = vector.load %arg6[%c0_10, %c0_11] : memref<1x256xf32, #tpu.memory_space<vmem>>, vector<1x256xf32>
    %13 = vector.broadcast %12 : vector<1x256xf32> to vector<128x256xf32>
    %14 = arith.addf %11, %13 : vector<128x256xf32>
    %15 = tpu.transpose %9, [1, 0] : vector<128x256xf32> -> vector<256x128xf32>
    %c0_12 = arith.constant 0 : index
    %c0_13 = arith.constant 0 : index
    %c0_14 = arith.constant 0 : index
    %16 = vector.load %arg7[%c0_12, %c0_13, %c0_14] : memref<1x256x128xf32, #tpu.memory_space<vmem>>, vector<1x128x128xf32>
    %17 = vector.shape_cast %16 : vector<1x128x128xf32> to vector<128x128xf32>
    %18 = vector.extract_strided_slice %15 {offsets = [0, 0], sizes = [128, 128], strides = [1, 1]} : vector<256x128xf32> to vector<128x128xf32>
    %19 = vector.extract_strided_slice %14 {offsets = [0, 0], sizes = [128, 128], strides = [1, 1]} : vector<128x256xf32> to vector<128x128xf32>
    %cst_15 = arith.constant dense<0.000000e+00> : vector<128x128xf32>
    %20 = tpu.matmul %18, %19, %cst_15 {dimension_numbers = #tpu.dot_dimension_numbers<[1], [0], [0], [1], [0, 0, 1, 1], [], []>} : vector<128x128xf32>, vector<128x128xf32>, vector<128x128xf32> -> vector<128x128xf32>
    %21 = arith.addf %17, %20 : vector<128x128xf32>
    %c0_16 = arith.constant 0 : index
    %c0_17 = arith.constant 0 : index
    %c0_18 = arith.constant 0 : index
    %22 = vector.load %arg7[%c0_16, %c0_17, %c0_18] : memref<1x256x128xf32, #tpu.memory_space<vmem>>, vector<1x128x128xf32>
    %23 = vector.shape_cast %22 : vector<1x128x128xf32> to vector<128x128xf32>
    %24 = vector.shape_cast %21 : vector<128x128xf32> to vector<1x128x128xf32>
    tpu.vector_store %arg7[%c0_16, %c0_17, %c0_18], %24 {strides = array<i32>} : memref<1x256x128xf32, #tpu.memory_space<vmem>>, vector<1x128x128xf32>,
    %c0_19 = arith.constant 0 : index
    %c128 = arith.constant 128 : index
    %c0_20 = arith.constant 0 : index
    %25 = vector.load %arg7[%c0_19, %c128, %c0_20] : memref<1x256x128xf32, #tpu.memory_space<vmem>>, vector<1x128x128xf32>
    %26 = vector.shape_cast %25 : vector<1x128x128xf32> to vector<128x128xf32>
    %27 = vector.extract_strided_slice %15 {offsets = [128, 0], sizes = [128, 128], strides = [1, 1]} : vector<256x128xf32> to vector<128x128xf32>
    %28 = vector.extract_strided_slice %14 {offsets = [0, 128], sizes = [128, 128], strides = [1, 1]} : vector<128x256xf32> to vector<128x128xf32>
    %cst_21 = arith.constant dense<0.000000e+00> : vector<128x128xf32>
    %29 = tpu.matmul %27, %28, %cst_21 {dimension_numbers = #tpu.dot_dimension_numbers<[1], [0], [0], [1], [0, 0, 1, 1], [], []>} : vector<128x128xf32>, vector<128x128xf32>, vector<128x128xf32> -> vector<128x128xf32>
    %30 = arith.addf %26, %29 : vector<128x128xf32>
    %c0_22 = arith.constant 0 : index
    %c128_23 = arith.constant 128 : index
    %c0_24 = arith.constant 0 : index
    %31 = vector.load %arg7[%c0_22, %c128_23, %c0_24] : memref<1x256x128xf32, #tpu.memory_space<vmem>>, vector<1x128x128xf32>
    %32 = vector.shape_cast %31 : vector<1x128x128xf32> to vector<128x128xf32>
    %33 = vector.shape_cast %30 : vector<128x128xf32> to vector<1x128x128xf32>
    tpu.vector_store %arg7[%c0_22, %c128_23, %c0_24], %33 {strides = array<i32>} : memref<1x256x128xf32, #tpu.memory_space<vmem>>, vector<1x128x128xf32>,
    return
  }
  func.func @transform_0(%arg0: i32, %arg1: i32) -> (i32, i32, i32) {
    %c0_i32 = arith.constant 0 : i32
    %c0_i32_0 = arith.constant 0 : i32
    return %arg0, %arg1, %c0_i32 : i32, i32, i32
  }
  func.func @transform_1(%arg0: i32, %arg1: i32) -> (i32, i32) {
    %c0_i32 = arith.constant 0 : i32
    %c0_i32_0 = arith.constant 0 : i32
    %c0_i32_1 = arith.constant 0 : i32
    return %c0_i32, %c0_i32_0 : i32, i32
  }
  func.func @transform_2(%arg0: i32, %arg1: i32) -> (i32, i32) {
    %c0_i32 = arith.constant 0 : i32
    %c0_i32_0 = arith.constant 0 : i32
    %c0_i32_1 = arith.constant 0 : i32
    return %c0_i32, %c0_i32_0 : i32, i32
  }
  func.func @transform_3(%arg0: i32, %arg1: i32) -> (i32, i32) {
    %c0_i32 = arith.constant 0 : i32
    %c0_i32_0 = arith.constant 0 : i32
    %c0_i32_1 = arith.constant 0 : i32
    return %c0_i32, %c0_i32_0 : i32, i32
  }
  func.func @transform_4(%arg0: i32, %arg1: i32) -> (i32, i32) {
    %c0_i32 = arith.constant 0 : i32
    %c0_i32_0 = arith.constant 0 : i32
    %c0_i32_1 = arith.constant 0 : i32
    return %c0_i32, %c0_i32_0 : i32, i32
  }
  func.func @transform_5(%arg0: i32, %arg1: i32) -> (i32, i32, i32) {
    %c0_i32 = arith.constant 0 : i32
    %c0_i32_0 = arith.constant 0 : i32
    %c0_i32_1 = arith.constant 0 : i32
    return %arg0, %c0_i32, %c0_i32_0 : i32, i32, i32
  }
}

</mosaic_0001>

<bundles_post_ra>
// kernel: tpu_custom_call.1
= control target key start
LH: loop header
LB: loop body
LE: loop exit
PB: predicated region body
PF: predicated region fallthrough
CT: control target
= control target key end

     0   :  { %s2186_s0 = inlined_call_operand.hbm [shape: f32[2,256,128], index: 0, kind: input, shape index: {}]   ;;  %s2187_s1 = inlined_call_operand.hbm [shape: f32[128,256], index: 1, kind: input, shape index: {}]   ;;  %s2188_s2 = inlined_call_operand.hbm [shape: f32[1,256], index: 2, kind: input, shape index: {}]   ;;  %s2189_s3 = inlined_call_operand.hbm [shape: f32[128,256], index: 3, kind: input, shape index: {}]   ;;  %s2190_s4 = inlined_call_operand.vmem [shape: f32[1,256], index: 4, kind: input, shape index: {}]   ;;  %s2191_s5 = inlined_call_operand.hbm [shape: f32[2,256,128], index: 5, kind: output, shape index: {}]  }
   0x1   :  { %2199 = sst [smem:[#allocation21_spill]] %s2187_s1 }
   0x2   :  { %2200 = sst [smem:[#allocation22_spill]] %s2188_s2 }
   0x3   :  { %2201 = sst [smem:[#allocation23_spill]] %s2189_s3 }
   0x4   :  { %2202 = sst [smem:[#allocation24_spill]] %s2190_s4 }
   0x5   :  { %2203 = sst [smem:[#allocation25_spill]] %s2191_s5 }
   0x6   :  { %10 = vsyncpa [#allocation3], 0 }
   0x7   :  { %12 = vsyncpa [#allocation3 + $0x1], 0 }
   0x8   :  { %13 = vsyncpa [#allocation6], 0 }
   0x9   :  { %14 = vsyncpa [#allocation9], 0 }
   0xa   :  { %15 = vsyncpa [#allocation4], 0 }
   0xb   :  { %17 = vsyncpa [#allocation4 + $0x1], 0  ;;  %s1682_s18 = smov 0   ;;  %s1684_s19 = smov 0  }
   0xc   :  { %s1686_s20 = smov 0   ;;  %s1688_s21 = smov 0  }
   0xd   :  { %s1690_s22 = smov 0   ;;  %s1692_s23 = smov 0  }
   0xe   :  { %s1694_s24 = smov 0   ;;  %s1696_s25 = smov 0  }
   0xf   :  { %s1698_s26 = smov 0   ;;  %s1700_s27 = smov 0  }
  0x10   :  { %s1702_s28 = smov 0  }
  0x11 LB: > { %2204 = sst [smem:[#allocation15_spill]] %s1598_s18  ;;  %s1120_s29 = sadd.s32 4294967295, %s1638_s28   ;;  %s1638_s28 = sphi %s1702_s28, %s23_s28   ;;  %s1634_s27 = sphi %s1700_s27, %s2238_s27   ;;  %s1630_s26 = sphi %s1698_s26, %s2237_s26   ;;  %s1626_s25 = sphi %s1696_s25, %s2236_s25   ;;  %s1622_s24 = sphi %s1694_s24, %s2235_s24   ;;  %s1618_s23 = sphi %s1692_s23, %s2234_s23   ;;  %s1614_s22 = sphi %s1690_s22, %s2233_s22   ;;  %s1610_s21 = sphi %s1688_s21, %s2232_s21   ;;  %s1606_s20 = sphi %s1686_s20, %s2231_s20   ;;  %s1602_s19 = sphi %s1684_s19, %s2230_s19   ;;  %s1598_s18 = sphi %s1682_s18, %s2229_s18  }
  0x12   : > { %2205 = sst [smem:[#allocation16_spill]] %s1626_s25  ;;  %s1121_s30 = sadd.s32 4294967294, %s1638_s28  }
  0x13   : > { %p57_p0 = scmp.ne.s32.totalorder %s1614_s22, %s1610_s21  ;;  %p1738_p1 = scmp.eq.s32.totalorder %s1120_s29, 0 }
  0x14   : > { %p164_p2 = scmp.ne.s32.totalorder %s1606_s20, %s1602_s19  ;;  %p165_p3 = scmp.eq.s32.totalorder %s1120_s29, 3 }
  0x15   : > { %p1746_p4 = por %p1738_p1, %p57_p0  ;;  %p170_p5 = scmp.ne.s32.totalorder %s1602_s19, %s1598_s18 }
  0x16   : > { %p1752_p6 = por %p165_p3, %p164_p2  ;;  %p171_p7 = scmp.eq.s32.totalorder %s1121_s30, 3 }
  0x17   : > { %p1122_p8 = scmp.ge.s32.totalorder %s1638_s28, 1  ;;  %p178_p9 = scmp.lt.s32.totalorder %s1638_s28, 5 }
  0x18   : > { %s2208_s8 = scalar_select %p1752_p6, 1, 0 }
  0x19   : > { %p1758_p10 = por %p171_p7, %p170_p5  ;;  %p1762_p11 = pnand %p1122_p8, %p178_p9 }
  0x1a   : > { %2209 = sst [smem:[#allocation17_spill]] %s2208_s8  ;;  %s1640_s14 = smov [#allocation5]  }
  0x1b   : > { %s2210_s9 = scalar_select %p1758_p10, 1, 0 }
  0x1c   : > { %s2213_s1 = sld [smem:[#allocation21_spill]]  ;;  %p1264_p12 = pneg %p1762_p11 }
  0x1d   : > { %2211 = sst [smem:[#allocation18_spill]] %s2210_s9  ;;  %s191_s15 = sshll.u32 %s1640_s14, 4  ;;  %s192_s15 = int_to_ptr.vmem [resolvable:$true] %s191_s15 }
  0x1e   : > { %p1773_p13 = pnand %p1264_p12, %p1738_p1  ;;  %s2215_s2 = sld [smem:[#allocation22_spill]] }
  0x1f   : > { %s1641_s30 = smov 256   ;;  %s1642_s11 = smov 16  }
  0x20   : > { %s2216_s3 = sld [smem:[#allocation23_spill]]  ;;  %s1643_s17 = smov [#allocation7]  }
  0x21   : > { %s206_s21 = sshll.u32 %s1643_s17, 4  ;;  %s44_s12 = sadd.s32 1, %s1618_s23  ;;  %s207_s21 = int_to_ptr.vmem [resolvable:$true] %s206_s21 }
  0x22   : > { %s189_s13 = sshll.u32 %s2213_s1, 4  ;;  %p51_p2 = scmp.ne.s32.totalorder %s1618_s23, %s1614_s22  ;;  %s190_s13 = int_to_ptr.hbm [resolvable:$true] %s189_s13 }
  0x23   : > { %1267 = dma.hbm_to_vmem [thread:$0]  (!%p1773_p13), %s190_s13, 4096, %s192_s15, [#allocation6], %s1641_s30, %s1641_s30, %s1642_s11  }
  0x24   : > { %s204_s29 = sshll.u32 %s2215_s2, 4  ;;  %s1644_s2 = smov [#allocation8]   ;;  %s205_s29 = int_to_ptr.hbm [resolvable:$true] %s204_s29 }
  0x25   : > { %1270 = dma.hbm_to_vmem [thread:$0]  (!%p1773_p13), %s205_s29, 32, %s207_s21, [#allocation6]  }
  0x26   : > { %s215_s1 = sshll.u32 %s2216_s3, 4  ;;  %s217_s9 = sshll.u32 %s1644_s2, 4  ;;  %s216_s1 = int_to_ptr.hbm [resolvable:$true] %s215_s1  ;;  %s218_s9 = int_to_ptr.vmem [resolvable:$true] %s217_s9 }
  0x27   : > { %1273 = dma.hbm_to_vmem [thread:$0]  (!%p1773_p13), %s216_s1, 4096, %s218_s9, [#allocation9], %s1641_s30, %s1641_s30, %s1642_s11  }
  0x28   : > { %s32_s13 = sadd.s32 1, %s1630_s26  ;;  %s35_s15 = sadd.s32 1, %s1634_s27 }
  0x29   : > { %p33_p0 = scmp.ge.s32.totalorder %s32_s13, 2  ;;  %p52_p3 = scmp.eq.s32.totalorder %s1638_s28, 0 }
  0x2a   : > { %s154_s1 = sadd.s32 1, %s1606_s20  ;;  %p1285_p8 = scmp.lt.s32.totalorder %s1638_s28, 4 }
  0x2b   : > { %s2240_s13 = smov (%p33_p0, %s32_s13), 0  ;;  %s2242_s15 = smov (!%p33_p0, %s35_s15), %s1634_s27 }
  0x2c   : > { %2217 = sst [smem:[#allocation19_spill]] %s2240_s13  ;;  %s40_s2 = ssub.s32 %s1630_s26, %s2240_s13 }
  0x2d   : > { %p1800_p5 = por %p52_p3, %p51_p2  ;;  %p37_p7 = scmp.ge.s32.totalorder %s2242_s15, 2 }
  0x2e   : > { %s234_s9 = sand.u32 1, %s1618_s23   ;;  %s1128_s14 = sshll.u32 %s1630_s26, 4 }
  0x2f   : > { %s2244_s15 = smov (%p37_p7, %s2242_s15), 0  ;;  %s1127_s16 = sshll.u32 %s234_s9, 7 }
  0x30   : > { %2219 = sst [smem:[#allocation20_spill]] %s2244_s15  ;;  %s39_s30 = ssub.s32 %s1634_s27, %s2244_s15 }
  0x31   : > { %s41_s11 = sor.u32 %s40_s2, %s39_s30  ;;  %p152_p9 = scmp.eq.s32.totalorder %s39_s30, 0 }
  0x32   : > { %p42_p12 = scmp.eq.s32.totalorder %s41_s11, 0  ;;  %s1129_s3 = sshll.u32 %s1634_s27, 5 }
  0x33   : > { %s1813_s17 = scalar_select %p152_p9, %s1606_s20, %s154_s1  }
  0x34   : > { %s1816_s21 = scalar_select %p42_p12, %s1618_s23, %s44_s12  }
  0x35   : > { %s238_s13 = scalar_lea.vmem [#allocation2], %s1127_s16  ;;  %s243_s8 = sadd.s32 %s1129_s3, %s1128_s14 }
  0x36   : > { %s248_s18 = sshll.u32 %s238_s13, 4  ;;  %s1130_s5 = sshll.u32 %s243_s8, 3  ;;  %s249_s18 = int_to_ptr.vmem [resolvable:$true] %s248_s18 }
  0x37   : > { %p1275_p13 = pnand %p1285_p8, %p1800_p5  ;;  %s245_s2 = scalar_lea.hbm %s2186_s0, %s1130_s5 }
  0x38   : > { %s246_s30 = sshll.u32 %s245_s2, 4  ;;  %s235_s11 = scalar_lea.sflag [#allocation3], %s234_s9  ;;  %s247_s30 = int_to_ptr.hbm [resolvable:$true] %s246_s30 }
  0x39   : > { %s1645_s1 = smov 128   ;;  %s1646_s15 = smov 8  }
  0x3a   : > { %1277 = dma.hbm_to_vmem [thread:$0]  (!%p1275_p13), %s247_s30, 2048, %s249_s18, %s235_s11, %s1645_s1, %s1645_s1, %s1646_s15  }
  0x3b   : > { %260 = sbr.rel (%p1762_p11) target bundleno = 743 (0x2e7), region = 40  ;;  %s262_s3 = sand.u32 (!%p1762_p11), 1, %s1614_s22  }
  0x3c   : > { %s1132_s8 = sshll.u32 (!%p1762_p11), %s262_s3, 7  ;;  %s263_s13 = scalar_lea.sflag (!%p1762_p11), [#allocation3], %s262_s3 }
  0x3d   : > { %s1829_s12 = scalar_lea.vmem (!%p1762_p11), [#allocation2], %s1132_s8 }
  0x40   : > { %1581 = dma.done.wait (%p1746_p4), %s263_s13, 2048  }
  0x41   : > { %1583 = vsyncadd (%p1746_p4), %s263_s13, 4294965248 }
  0x42   : > { %1585 = dma.done.wait (%p1738_p1), [#allocation6], 4128  }
  0x43   : > { %1587 = vsyncadd (%p1738_p1), [#allocation6], 4294963168 }
  0x44   : > { %1589 = dma.done.wait (%p1738_p1), [#allocation9], 4096  }
  0x45   : > { %1591 = vsyncadd (%p1738_p1), [#allocation9], 4294963200  ;;  %s306_s4 = sand.u32 1, %s1602_s19   ;;  %p1137_p4 = scmp.ne.s32.totalorder %s1622_s24, 0 }
  0x46   : > { %s1136_s5 = sshll.u32 %s306_s4, 8 }
  0x47   : > { %s1846_s18 = scalar_lea.vmem [#allocation10], %s1136_s5  ;;  %313 = sbr.rel (%p1137_p4) target bundleno = 109 (0x6d), region = 60 }
  0x4c   : > { %v1647_v0 = vmov 0.0  }
  0x4d   : > { %314 = vst [vmem:[%s1846_s18] sm:$0xff] %v1647_v0 }
  0x4e   : > { %315 = vst [vmem:[%s1846_s18 + $0x8] sm:$0xff] %v1647_v0 }
  0x4f   : > { %316 = vst [vmem:[%s1846_s18 + $0x10] sm:$0xff] %v1647_v0 }
  0x50   : > { %317 = vst [vmem:[%s1846_s18 + $0x18] sm:$0xff] %v1647_v0 }
  0x51   : > { %318 = vst [vmem:[%s1846_s18 + $0x20] sm:$0xff] %v1647_v0 }
  0x52   : > { %319 = vst [vmem:[%s1846_s18 + $0x28] sm:$0xff] %v1647_v0 }
  0x53   : > { %320 = vst [vmem:[%s1846_s18 + $0x30] sm:$0xff] %v1647_v0 }
  0x54   : > { %321 = vst [vmem:[%s1846_s18 + $0x38] sm:$0xff] %v1647_v0 }
  0x55   : > { %322 = vst [vmem:[%s1846_s18 + $0x40] sm:$0xff] %v1647_v0 }
  0x56   : > { %323 = vst [vmem:[%s1846_s18 + $0x48] sm:$0xff] %v1647_v0 }
  0x57   : > { %324 = vst [vmem:[%s1846_s18 + $0x50] sm:$0xff] %v1647_v0 }
  0x58   : > { %325 = vst [vmem:[%s1846_s18 + $0x58] sm:$0xff] %v1647_v0 }
  0x59   : > { %326 = vst [vmem:[%s1846_s18 + $0x60] sm:$0xff] %v1647_v0 }
  0x5a   : > { %327 = vst [vmem:[%s1846_s18 + $0x68] sm:$0xff] %v1647_v0 }
  0x5b   : > { %328 = vst [vmem:[%s1846_s18 + $0x70] sm:$0xff] %v1647_v0 }
  0x5c   : > { %329 = vst [vmem:[%s1846_s18 + $0x78] sm:$0xff] %v1647_v0 }
  0x5d   : > { %330 = vst [vmem:[%s1846_s18 + $0x80] sm:$0xff] %v1647_v0 }
  0x5e   : > { %331 = vst [vmem:[%s1846_s18 + $0x88] sm:$0xff] %v1647_v0 }
  0x5f   : > { %332 = vst [vmem:[%s1846_s18 + $0x90] sm:$0xff] %v1647_v0 }
  0x60   : > { %333 = vst [vmem:[%s1846_s18 + $0x98] sm:$0xff] %v1647_v0 }
  0x61   : > { %334 = vst [vmem:[%s1846_s18 + $0xa0] sm:$0xff] %v1647_v0 }
  0x62   : > { %335 = vst [vmem:[%s1846_s18 + $0xa8] sm:$0xff] %v1647_v0 }
  0x63   : > { %336 = vst [vmem:[%s1846_s18 + $0xb0] sm:$0xff] %v1647_v0 }
  0x64   : > { %337 = vst [vmem:[%s1846_s18 + $0xb8] sm:$0xff] %v1647_v0 }
  0x65   : > { %338 = vst [vmem:[%s1846_s18 + $0xc0] sm:$0xff] %v1647_v0 }
  0x66   : > { %339 = vst [vmem:[%s1846_s18 + $0xc8] sm:$0xff] %v1647_v0 }
  0x67   : > { %340 = vst [vmem:[%s1846_s18 + $0xd0] sm:$0xff] %v1647_v0 }
  0x68   : > { %341 = vst [vmem:[%s1846_s18 + $0xd8] sm:$0xff] %v1647_v0 }
  0x69   : > { %342 = vst [vmem:[%s1846_s18 + $0xe0] sm:$0xff] %v1647_v0 }
  0x6a   : > { %343 = vst [vmem:[%s1846_s18 + $0xe8] sm:$0xff] %v1647_v0 }
  0x6b   : > { %344 = vst [vmem:[%s1846_s18 + $0xf0] sm:$0xff] %v1647_v0 }
  0x6c   : > { %345 = vst [vmem:[%s1846_s18 + $0xf8] sm:$0xff] %v1647_v0 }
  0x6d PF: > { %v392_v1 = vld [vmem:[#allocation5 + $0xf0] sm:$0xff]  ;;  %v393_v2 = vld [vmem:[#allocation5 + $0xf8] sm:$0xff]  ;;  %v390_v3 = vld [vmem:[#allocation5 + $0xe0] sm:$0xff]  ;;  %s2220_s6 = sld [smem:[#allocation24_spill]]  ;;  %s1001_s2 = sshll.u32 %s1846_s18, 4  ;;  %s1002_s2 = int_to_ptr.vmem [resolvable:$true] %s1001_s2 }
  0x6e   : > { %1144 = vmatpush.msra.mxu2 %v392_v1  ;;  %1160 = vmatpush.msra.mxu3 %v393_v2  ;;  %v391_v4 = vld [vmem:[#allocation5 + $0xe8] sm:$0xff]  ;;  %v388_v5 = vld [vmem:[#allocation5 + $0xd0] sm:$0xff]  ;;  %v389_v6 = vld [vmem:[#allocation5 + $0xd8] sm:$0xff]  ;;  %s2221_s7 = sld [smem:[#allocation16_spill]]  ;;  %s989_s11 = scalar_lea.sflag [#allocation4], %s306_s4 }
  0x6f   : > { %400 = vmatpush.msra.mxu0 %v392_v1  ;;  %465 = vmatpush.msra.mxu1 %v393_v2  ;;  %v386_v7 = vld [vmem:[#allocation5 + $0xc0] sm:$0xff]  ;;  %v387_v8 = vld [vmem:[#allocation5 + $0xc8] sm:$0xff]  ;;  %v384_v9 = vld [vmem:[#allocation5 + $0xb0] sm:$0xff]  ;;  %s2222_s9 = sld [smem:[#allocation25_spill]] }
  0x70   : > { %1145 = vmatpush.msra.mxu2 %v390_v3  ;;  %1161 = vmatpush.msra.mxu3 %v391_v4  ;;  %v385_v10 = vld [vmem:[#allocation5 + $0xb8] sm:$0xff]  ;;  %v382_v11 = vld [vmem:[#allocation5 + $0xa0] sm:$0xff]  ;;  %v383_v12 = vld [vmem:[#allocation5 + $0xa8] sm:$0xff] }
  0x71   : > { %401 = vmatpush.msra.mxu0 %v390_v3  ;;  %466 = vmatpush.msra.mxu1 %v391_v4  ;;  %v380_v13 = vld [vmem:[#allocation5 + $0x90] sm:$0xff]  ;;  %v381_v14 = vld [vmem:[#allocation5 + $0x98] sm:$0xff]  ;;  %v378_v15 = vld [vmem:[#allocation5 + $0x80] sm:$0xff] }
  0x72   : > { %1146 = vmatpush.msra.mxu2 %v388_v5  ;;  %1162 = vmatpush.msra.mxu3 %v389_v6  ;;  %v379_v16 = vld [vmem:[#allocation5 + $0x88] sm:$0xff]  ;;  %v376_v17 = vld [vmem:[#allocation5 + $0x70] sm:$0xff]  ;;  %v377_v18 = vld [vmem:[#allocation5 + $0x78] sm:$0xff] }
  0x73   : > { %402 = vmatpush.msra.mxu0 %v388_v5  ;;  %467 = vmatpush.msra.mxu1 %v389_v6  ;;  %v374_v19 = vld [vmem:[#allocation5 + $0x60] sm:$0xff]  ;;  %v375_v20 = vld [vmem:[#allocation5 + $0x68] sm:$0xff]  ;;  %v372_v21 = vld [vmem:[#allocation5 + $0x50] sm:$0xff] }
  0x74   : > { %1147 = vmatpush.msra.mxu2 %v386_v7  ;;  %1163 = vmatpush.msra.mxu3 %v387_v8  ;;  %v373_v22 = vld [vmem:[#allocation5 + $0x58] sm:$0xff]  ;;  %v370_v23 = vld [vmem:[#allocation5 + $0x40] sm:$0xff]  ;;  %v371_v24 = vld [vmem:[#allocation5 + $0x48] sm:$0xff]  ;;  %s1143_s10 = sshll.u32 %s2221_s7, 8 }
  0x75   : > { %403 = vmatpush.msra.mxu0 %v386_v7  ;;  %468 = vmatpush.msra.mxu1 %v387_v8  ;;  %v368_v25 = vld [vmem:[#allocation5 + $0x30] sm:$0xff]  ;;  %v369_v26 = vld [vmem:[#allocation5 + $0x38] sm:$0xff]  ;;  %v366_v27 = vld [vmem:[#allocation5 + $0x20] sm:$0xff]  ;;  %s1000_s16 = scalar_lea.hbm %s2222_s9, %s1143_s10 }
  0x76   : > { %1148 = vmatpush.msra.mxu2 %v384_v9  ;;  %1164 = vmatpush.msra.mxu3 %v385_v10  ;;  %v367_v28 = vld [vmem:[#allocation5 + $0x28] sm:$0xff]  ;;  %v364_v29 = vld [vmem:[#allocation5 + $0x10] sm:$0xff]  ;;  %v365_v30 = vld [vmem:[#allocation5 + $0x18] sm:$0xff]  ;;  %s1003_s30 = sshll.u32 %s1000_s16, 4  ;;  %s1004_s30 = int_to_ptr.hbm [resolvable:$true] %s1003_s30 }
  0x77   : > { %404 = vmatpush.msra.mxu0 %v384_v9  ;;  %469 = vmatpush.msra.mxu1 %v385_v10  ;;  %v362_v31 = vld [vmem:[#allocation5] sm:$0xff]  ;;  %v363_v32 = vld [vmem:[#allocation5 + $0x8] sm:$0xff]  ;;  %v560_v34 = vld [vmem:[#allocation8 + $0xf0] sm:$0xff]  ;;  %s1522_s1 = sshra.s32 %s1004_s30, 4  ;;  %s1523_s1 = int_to_ptr.hbm [resolvable:$true] %s1522_s1 }
  0x78   : > { %1149 = vmatpush.msra.mxu2 %v382_v11  ;;  %1165 = vmatpush.msra.mxu3 %v383_v12  ;;  %v1882_v33 = vld [vmem:[%s1829_s12 + $0x40] sm:$0xff]  ;;  %v559_v37 = vld [vmem:[#allocation8 + $0xe8] sm:$0xff]  ;;  %v556_v38 = vld [vmem:[#allocation8 + $0xd0] sm:$0xff]  ;;  %s1524_s3 = scalar_lea.hbm %s1523_s1, 256  ;;  %p1529_p2 = scmp.lt.s32.totalorder %s1523_s1, %s2222_s9 }
  0x79   : > { %405 = vmatpush.msra.mxu0 %v382_v11  ;;  %470 = vmatpush.msra.mxu1 %v383_v12  ;;  %v561_v35 = vld [vmem:[#allocation8 + $0xf8] sm:$0xff]  ;;  %v558_v36 = vld [vmem:[#allocation8 + $0xe0] sm:$0xff]  ;;  %v555_v41 = vld [vmem:[#allocation8 + $0xc8] sm:$0xff]  ;;  %p1525_p1 = scmp.ne.s32.totalorder %s1523_s1, %s1524_s3 }
  0x7a   : > { %1150 = vmatpush.msra.mxu2 %v380_v13  ;;  %1166 = vmatpush.msra.mxu3 %v381_v14  ;;  %v557_v39 = vld [vmem:[#allocation8 + $0xd8] sm:$0xff]  ;;  %v554_v40 = vld [vmem:[#allocation8 + $0xc0] sm:$0xff]  ;;  %v552_v43 = vld [vmem:[#allocation8 + $0xb0] sm:$0xff] }
  0x7b   : > { %406 = vmatpush.msra.mxu0 %v380_v13  ;;  %471 = vmatpush.msra.mxu1 %v381_v14  ;;  %v1887_v42 = vld [vmem:[%s1829_s12 + $0x48] sm:$0xff]  ;;  %v553_v44 = vld [vmem:[#allocation8 + $0xb8] sm:$0xff]  ;;  %v548_v47 = vld [vmem:[#allocation8 + $0x90] sm:$0xff]  ;;  %p1526_p11 = pnand %p1525_p1, %p1752_p6 }
  0x7c   : > { %1151 = vmatpush.msra.mxu2 %v378_v15  ;;  %1167 = vmatpush.msra.mxu3 %v379_v16  ;;  %v550_v45 = vld [vmem:[#allocation8 + $0xa0] sm:$0xff]  ;;  %v551_v46 = vld [vmem:[#allocation8 + $0xa8] sm:$0xff]  ;;  %v549_v48 = vld [vmem:[#allocation8 + $0x98] sm:$0xff] }
  0x7d   : > { %407 = vmatpush.msra.mxu0 %v378_v15  ;;  %472 = vmatpush.msra.mxu1 %v379_v16  ;;  %v546_v49 = vld [vmem:[#allocation8 + $0x80] sm:$0xff]  ;;  %v547_v50 = vld [vmem:[#allocation8 + $0x88] sm:$0xff]  ;;  %v544_v53 = vld [vmem:[#allocation8 + $0x70] sm:$0xff]  ;;  %p1527_p0 = pneg %p1526_p11 }
  0x7e   : > { %1152 = vmatpush.msra.mxu2 %v376_v17  ;;  %1168 = vmatpush.msra.mxu3 %v377_v18  ;;  %v1892_v51 = vld [vmem:[%s1829_s12 + $0x50] sm:$0xff]  ;;  %v1895_v52 = vld [vmem:[%s1829_s12] sm:$0xff]  ;;  %v1902_v61 = vld [vmem:[%s1829_s12 + $0x58] sm:$0xff] }
  0x7f   : > { %408 = vmatpush.msra.mxu0 %v376_v17  ;;  %473 = vmatpush.msra.mxu1 %v377_v18  ;;  %v545_v54 = vld [vmem:[#allocation8 + $0x78] sm:$0xff]  ;;  %v542_v55 = vld [vmem:[#allocation8 + $0x60] sm:$0xff]  ;;  %v543_v56 = vld [vmem:[#allocation8 + $0x68] sm:$0xff] }
  0x80   : > { %1153 = vmatpush.msra.mxu2 %v374_v19  ;;  %1169 = vmatpush.msra.mxu3 %v375_v20  ;;  %v540_v57 = vld [vmem:[#allocation8 + $0x50] sm:$0xff]  ;;  %v541_v58 = vld [vmem:[#allocation8 + $0x58] sm:$0xff]  ;;  %v538_v59 = vld [vmem:[#allocation8 + $0x40] sm:$0xff] }
  0x81   : > { %409 = vmatpush.msra.mxu0 %v374_v19  ;;  %474 = vmatpush.msra.mxu1 %v375_v20  ;;  %v539_v60 = vld [vmem:[#allocation8 + $0x48] sm:$0xff]  ;;  %v536_v63 = vld [vmem:[#allocation8 + $0x30] sm:$0xff]  ;;  %v537_v0 = vld [vmem:[#allocation8 + $0x38] sm:$0xff] }
  0x82   : > { %1154 = vmatpush.msra.mxu2 %v372_v21  ;;  %1170 = vmatpush.msra.mxu3 %v373_v22  ;;  %v347_v62 = vld [vmem:[%s1829_s12 + $0x8] sm:$0xff]  ;;  %v532_v3 = vld [vmem:[#allocation8 + $0x10] sm:$0xff]  ;;  %v533_v4 = vld [vmem:[#allocation8 + $0x18] sm:$0xff] }
  0x83   : > { %410 = vmatpush.msra.mxu0 %v372_v21  ;;  %475 = vmatpush.msra.mxu1 %v373_v22  ;;  %v534_v1 = vld [vmem:[#allocation8 + $0x20] sm:$0xff]  ;;  %v535_v2 = vld [vmem:[#allocation8 + $0x28] sm:$0xff]  ;;  %v349_v10 = vld [vmem:[%s1829_s12 + $0x18] sm:$0xff] }
  0x84   : > { %1155 = vmatpush.msra.mxu2 %v370_v23  ;;  %1171 = vmatpush.msra.mxu3 %v371_v24  ;;  %v530_v5 = vld [vmem:[#allocation8] sm:$0xff]  ;;  %v531_v6 = vld [vmem:[#allocation8 + $0x8] sm:$0xff]  ;;  %v1926_v13 = vld [vmem:[%s1829_s12 + $0x78] sm:$0xff] }
  0x85   : > { %411 = vmatpush.msra.mxu0 %v370_v23  ;;  %476 = vmatpush.msra.mxu1 %v371_v24  ;;  %v1908_v7 = vld [vmem:[%s1829_s12 + $0x60] sm:$0xff]  ;;  %v348_v8 = vld [vmem:[%s1829_s12 + $0x10] sm:$0xff]  ;;  %v1914_v9 = vld [vmem:[%s1829_s12 + $0x68] sm:$0xff] }
  0x86   : > { %1156 = vmatpush.msra.mxu2 %v368_v25  ;;  %1172 = vmatpush.msra.mxu3 %v369_v26  ;;  %v1920_v11 = vld [vmem:[%s1829_s12 + $0x70] sm:$0xff]  ;;  %v350_v12 = vld [vmem:[%s1829_s12 + $0x20] sm:$0xff]  ;;  %v351_v14 = vld [vmem:[%s1829_s12 + $0x28] sm:$0xff] }
  0x87   : > { %412 = vmatpush.msra.mxu0 %v368_v25  ;;  %477 = vmatpush.msra.mxu1 %v369_v26  ;;  %v352_v15 = vld [vmem:[%s1829_s12 + $0x30] sm:$0xff]  ;;  %v353_v16 = vld [vmem:[%s1829_s12 + $0x38] sm:$0xff]  ;;  %s1528_s12 = scalar_lea.hbm %s2222_s9, 512 }
  0x88   : > { %1157 = vmatpush.msra.mxu2 %v366_v27  ;;  %1173 = vmatpush.msra.mxu3 %v367_v28  ;;  %p1530_p3 = scmp.lt.s32.totalorder %s1528_s12, %s1524_s3 }
  0x89   : > { %413 = vmatpush.msra.mxu0 %v366_v27  ;;  %478 = vmatpush.msra.mxu1 %v367_v28 }
  0x8a   : > { %1158 = vmatpush.msra.mxu2 %v364_v29  ;;  %1174 = vmatpush.msra.mxu3 %v365_v30  ;;  %p1531_p5 = por %p1530_p3, %p1529_p2 }
  0x8b   : > { %414 = vmatpush.msra.mxu0 %v364_v29  ;;  %479 = vmatpush.msra.mxu1 %v365_v30 }
  0x8c   : > { %1159 = vmatpush.msra.mxu2 %v362_v31  ;;  %1175 = vmatpush.msra.mxu3 %v363_v32  ;;  %p1532_p7 = pnand %p1531_p5, %p1527_p0 }
  0x8d   : > { %440 = vmatmul.f32.vlgmr.msra.gmra.mxu2 %v1882_v33  ;;  %505 = vmatmul.f32.vlgmr.msra.gmra.mxu3 %v1882_v33 }
  0x8e   : > { %568 = vmatpush.msrb.mxu2 %v560_v34  ;;  %633 = vmatpush.msrb.mxu3 %v561_v35 }
  0x8f   : > { %415 = vmatpush.msra.mxu0 %v362_v31  ;;  %480 = vmatpush.msra.mxu1 %v363_v32 }
  0x90   : > { %569 = vmatpush.msrb.mxu2 %v558_v36  ;;  %634 = vmatpush.msrb.mxu3 %v559_v37 }
  0x91   : > { %416 = vmatmul.f32.vlgmr.msra.gmra.mxu0 %v1895_v52  ;;  %481 = vmatmul.f32.vlgmr.msra.gmra.mxu1 %v1895_v52 }
  0x92   : > { %570 = vmatpush.msrb.mxu2 %v556_v38  ;;  %635 = vmatpush.msrb.mxu3 %v557_v39 }
  0x94   : > { %571 = vmatpush.msrb.mxu2 %v554_v40  ;;  %636 = vmatpush.msrb.mxu3 %v555_v41  ;;  %v394_v41 = vld [vmem:[#allocation7] sm:$0x3] }
  0x95   : > { %443 = vmatmul.f32.gmra.mxu2 %v1887_v42  ;;  %508 = vmatmul.f32.gmra.mxu3 %v1887_v42 }
  0x96   : > { %572 = vmatpush.msrb.mxu2 %v552_v43  ;;  %637 = vmatpush.msrb.mxu3 %v553_v44  ;;  %v1979_v44 = vperm.slane %v394_v41, 0 }
  0x98   : > { %573 = vmatpush.msrb.mxu2 %v550_v45  ;;  %638 = vmatpush.msrb.mxu3 %v551_v46  ;;  %v1981_v45 = vperm.slane %v394_v41, 1 }
  0x99   : > { %419 = vmatmul.f32.gmra.mxu0 %v347_v62  ;;  %484 = vmatmul.f32.gmra.mxu1 %v347_v62 }
  0x9a   : > { %574 = vmatpush.msrb.mxu2 %v548_v47  ;;  %639 = vmatpush.msrb.mxu3 %v549_v48 }
  0x9c   : > { %575 = vmatpush.msrb.mxu2 %v546_v49  ;;  %640 = vmatpush.msrb.mxu3 %v547_v50 }
  0x9d   : > { %446 = vmatmul.f32.gmra.mxu2 %v1892_v51  ;;  %511 = vmatmul.f32.gmra.mxu3 %v1892_v51 }
  0x9e   : > { %576 = vmatpush.msrb.mxu2 %v544_v53  ;;  %641 = vmatpush.msrb.mxu3 %v545_v54 }
  0xa0   : > { %577 = vmatpush.msrb.mxu2 %v542_v55  ;;  %642 = vmatpush.msrb.mxu3 %v543_v56 }
  0xa1   : > { %422 = vmatmul.f32.gmra.mxu0 %v348_v8  ;;  %487 = vmatmul.f32.gmra.mxu1 %v348_v8 }
  0xa2   : > { %578 = vmatpush.msrb.mxu2 %v540_v57  ;;  %643 = vmatpush.msrb.mxu3 %v541_v58 }
  0xa4   : > { %579 = vmatpush.msrb.mxu2 %v538_v59  ;;  %644 = vmatpush.msrb.mxu3 %v539_v60 }
  0xa5   : > { %449 = vmatmul.f32.gmra.mxu2 %v1902_v61  ;;  %514 = vmatmul.f32.gmra.mxu3 %v1902_v61 }
  0xa6   : > { %580 = vmatpush.msrb.mxu2 %v536_v63  ;;  %645 = vmatpush.msrb.mxu3 %v537_v0 }
  0xa8   : > { %581 = vmatpush.msrb.mxu2 %v534_v1  ;;  %646 = vmatpush.msrb.mxu3 %v535_v2 }
  0xa9   : > { %425 = vmatmul.f32.gmra.mxu0 %v349_v10  ;;  %490 = vmatmul.f32.gmra.mxu1 %v349_v10 }
  0xaa   : > { %582 = vmatpush.msrb.mxu2 %v532_v3  ;;  %647 = vmatpush.msrb.mxu3 %v533_v4 }
  0xac   : > { %583 = vmatpush.msrb.mxu2 %v530_v5  ;;  %648 = vmatpush.msrb.mxu3 %v531_v6 }
  0xad   : > { %452 = vmatmul.f32.gmra.mxu2 %v1908_v7  ;;  %517 = vmatmul.f32.gmra.mxu3 %v1908_v7 }
  0xb1   : > { %428 = vmatmul.f32.gmra.mxu0 %v350_v12  ;;  %493 = vmatmul.f32.gmra.mxu1 %v350_v12 }
  0xb5   : > { %455 = vmatmul.f32.gmra.mxu2 %v1914_v9  ;;  %520 = vmatmul.f32.gmra.mxu3 %v1914_v9 }
  0xb9   : > { %431 = vmatmul.f32.gmra.mxu0 %v351_v14  ;;  %496 = vmatmul.f32.gmra.mxu1 %v351_v14 }
  0xbd   : > { %458 = vmatmul.f32.gmra.mxu2 %v1920_v11  ;;  %523 = vmatmul.f32.gmra.mxu3 %v1920_v11 }
  0xc1   : > { %434 = vmatmul.f32.gmra.mxu0 %v352_v15  ;;  %499 = vmatmul.f32.gmra.mxu1 %v352_v15 }
  0xc5   : > { %461 = vmatmul.f32.gmra.mxu2 %v1926_v13  ;;  %526 = vmatmul.f32.gmra.mxu3 %v1926_v13 }
  0xc9   : > { %437 = vmatmul.f32.gmra.mxu0 %v353_v16  ;;  %502 = vmatmul.f32.gmra.mxu1 %v353_v16 }
  0xcd   : > { %584 = vmatmul.f32.vlgmr.msrb.gmra.mxu2 %v1895_v52  ;;  %649 = vmatmul.f32.vlgmr.msrb.gmra.mxu3 %v1895_v52 }
  0xd5   : > { %587 = vmatmul.f32.gmra.mxu2 %v347_v62  ;;  %652 = vmatmul.f32.gmra.mxu3 %v347_v62 }
  0xdd   : > { %590 = vmatmul.f32.gmra.mxu2 %v348_v8  ;;  %655 = vmatmul.f32.gmra.mxu3 %v348_v8 }
  0xe5   : > { %593 = vmatmul.f32.gmra.mxu2 %v349_v10  ;;  %658 = vmatmul.f32.gmra.mxu3 %v349_v10 }
  0xed   : > { %596 = vmatmul.f32.gmra.mxu2 %v350_v12  ;;  %661 = vmatmul.f32.gmra.mxu3 %v350_v12 }
  0xf5   : > { %599 = vmatmul.f32.gmra.mxu2 %v351_v14  ;;  %664 = vmatmul.f32.gmra.mxu3 %v351_v14 }
  0xfd   : > { %602 = vmatmul.f32.gmra.mxu2 %v352_v15  ;;  %667 = vmatmul.f32.gmra.mxu3 %v352_v15 }
 0x105   : > { %605 = vmatmul.f32.gmra.mxu2 %v353_v16  ;;  %670 = vmatmul.f32.gmra.mxu3 %v353_v16 }
 0x10d   : > { %608 = vmatmul.f32.gmra.mxu2 %v1882_v33  ;;  %673 = vmatmul.f32.gmra.mxu3 %v1882_v33 }
 0x10e   : > { %v1947_v21 = vpop.f32.mrf.mxu0  ;;  %v1949_v22 = vpop.f32.mrf.mxu1 }
 0x110   : > { %v1937_v17 = vpop.f32.mrf.mxu2  ;;  %v1939_v18 = vpop.f32.mrf.mxu3 }
 0x111   : > { %v442_v4 = vadd.f32 %v1937_v17, %v1979_v44  ;;  %v507_v5 = vadd.f32 %v1939_v18, %v1981_v45 }
 0x115   : > { %611 = vmatmul.f32.gmra.mxu2 %v1887_v42  ;;  %676 = vmatmul.f32.gmra.mxu3 %v1887_v42 }
 0x116   : > { %v1953_v25 = vpop.f32.mrf.mxu0  ;;  %v1955_v26 = vpop.f32.mrf.mxu1 }
 0x118   : > { %v1943_v19 = vpop.f32.mrf.mxu2  ;;  %v1945_v20 = vpop.f32.mrf.mxu3 }
 0x119   : > { %v445_v2 = vadd.f32 %v1943_v19, %v1979_v44  ;;  %v510_v3 = vadd.f32 %v1945_v20, %v1981_v45 }
 0x11d   : > { %614 = vmatmul.f32.gmra.mxu2 %v1892_v51  ;;  %679 = vmatmul.f32.gmra.mxu3 %v1892_v51 }
 0x11e   : > { %v1959_v29 = vpop.f32.mrf.mxu0  ;;  %v1961_v30 = vpop.f32.mrf.mxu1 }
 0x11f   : > { %v424_v20 = vadd.f32 %v1959_v29, %v1979_v44 }
 0x120   : > { %v447_v23 = vpop.f32.mrf.mxu2  ;;  %v512_v24 = vpop.f32.mrf.mxu3 }
 0x121   : > { %v448_v62 = vadd.f32 %v447_v23, %v1979_v44  ;;  %v513_v63 = vadd.f32 %v512_v24, %v1981_v45  ;;  %v489_v23 = vadd.f32 %v1961_v30, %v1981_v45  ;;  %v421_v24 = vadd.f32 %v1953_v25, %v1979_v44 }
 0x125   : > { %617 = vmatmul.f32.gmra.mxu2 %v1902_v61  ;;  %682 = vmatmul.f32.gmra.mxu3 %v1902_v61 }
 0x126   : > { %v1965_v33 = vpop.f32.mrf.mxu0  ;;  %v1967_v34 = vpop.f32.mrf.mxu1 }
 0x127   : > { %v427_v16 = vadd.f32 %v1965_v33, %v1979_v44  ;;  %v492_v17 = vadd.f32 %v1967_v34, %v1981_v45 }
 0x128   : > { %v450_v27 = vpop.f32.mrf.mxu2  ;;  %v515_v28 = vpop.f32.mrf.mxu3 }
 0x129   : > { %v451_v60 = vadd.f32 %v450_v27, %v1979_v44  ;;  %v516_v61 = vadd.f32 %v515_v28, %v1981_v45  ;;  %v486_v27 = vadd.f32 %v1955_v26, %v1981_v45  ;;  %v418_v28 = vadd.f32 %v1947_v21, %v1979_v44 }
 0x12d   : > { %620 = vmatmul.f32.gmra.mxu2 %v1908_v7  ;;  %685 = vmatmul.f32.gmra.mxu3 %v1908_v7 }
 0x12e   : > { %v1971_v37 = vpop.f32.mrf.mxu0  ;;  %v1973_v38 = vpop.f32.mrf.mxu1 }
 0x12f   : > { %v430_v14 = vadd.f32 %v1971_v37, %v1979_v44  ;;  %v495_v15 = vadd.f32 %v1973_v38, %v1981_v45 }
 0x130   : > { %v453_v31 = vpop.f32.mrf.mxu2  ;;  %v518_v32 = vpop.f32.mrf.mxu3 }
 0x131   : > { %v454_v56 = vadd.f32 %v453_v31, %v1979_v44  ;;  %v519_v57 = vadd.f32 %v518_v32, %v1981_v45  ;;  %v483_v31 = vadd.f32 %v1949_v22, %v1981_v45 }
 0x135   : > { %623 = vmatmul.f32.gmra.mxu2 %v1914_v9  ;;  %688 = vmatmul.f32.gmra.mxu3 %v1914_v9 }
 0x136   : > { %v432_v42 = vpop.f32.mrf.mxu0  ;;  %v497_v43 = vpop.f32.mrf.mxu1 }
 0x137   : > { %v433_v12 = vadd.f32 %v432_v42, %v1979_v44 }
 0x138   : > { %v456_v35 = vpop.f32.mrf.mxu2  ;;  %v521_v36 = vpop.f32.mrf.mxu3 }
 0x139   : > { %v457_v54 = vadd.f32 %v456_v35, %v1979_v44  ;;  %v522_v55 = vadd.f32 %v521_v36, %v1981_v45 }
 0x13d   : > { %626 = vmatmul.f32.gmra.mxu2 %v1920_v11  ;;  %691 = vmatmul.f32.gmra.mxu3 %v1920_v11 }
 0x13e   : > { %v435_v52 = vpop.f32.mrf.mxu0  ;;  %v500_v53 = vpop.f32.mrf.mxu1 }
 0x13f   : > { %v436_v10 = vadd.f32 %v435_v52, %v1979_v44  ;;  %v501_v11 = vadd.f32 %v500_v53, %v1981_v45 }
 0x140   : > { %v459_v39 = vpop.f32.mrf.mxu2  ;;  %v524_v40 = vpop.f32.mrf.mxu3 }
 0x141   : > { %v460_v50 = vadd.f32 %v459_v39, %v1979_v44  ;;  %v525_v51 = vadd.f32 %v524_v40, %v1981_v45 }
 0x145   : > { %629 = vmatmul.f32.gmra.mxu2 %v1926_v13  ;;  %694 = vmatmul.f32.gmra.mxu3 %v1926_v13  ;;  %v498_v13 = vadd.f32 %v497_v43, %v1981_v45 }
 0x146   : > { %v438_v0 = vpop.f32.mrf.mxu0  ;;  %v503_v1 = vpop.f32.mrf.mxu1 }
 0x147   : > { %v439_v6 = vadd.f32 %v438_v0, %v1979_v44  ;;  %v504_v7 = vadd.f32 %v503_v1, %v1981_v45 }
 0x148   : > { %v462_v46 = vpop.f32.mrf.mxu2  ;;  %v527_v47 = vpop.f32.mrf.mxu3 }
 0x149   : > { %v463_v48 = vadd.f32 %v462_v46, %v1979_v44  ;;  %v528_v49 = vadd.f32 %v527_v47, %v1981_v45 }
 0x14b   : > { %1179 = vmatpush.lsf.msrb.mxu0 %v463_v48  ;;  %1215 = vmatpush.lsf.msrb.mxu1 %v528_v49 }
 0x14d   : > { %1180 = vmatpush.lsf.msrb.mxu0 %v460_v50  ;;  %1216 = vmatpush.lsf.msrb.mxu1 %v525_v51  ;;  %v562_v50 = vld [vmem:[%s2220_s6] sm:$0x3] }
 0x14e   : > { %v564_v51 = vperm.slane %v562_v50, 0  ;;  %v565_v52 = vperm.slane %v562_v50, 1 }
 0x14f   : > { %1181 = vmatpush.lsf.msrb.mxu0 %v457_v54  ;;  %1217 = vmatpush.lsf.msrb.mxu1 %v522_v55 }
 0x150   : > { %v1991_v58 = vpop.f32.mrf.mxu2  ;;  %v1993_v59 = vpop.f32.mrf.mxu3 }
 0x151   : > { %1182 = vmatpush.lsf.msrb.mxu0 %v454_v56  ;;  %1218 = vmatpush.lsf.msrb.mxu1 %v519_v57 }
 0x153   : > { %1183 = vmatpush.lsf.msrb.mxu0 %v451_v60  ;;  %1219 = vmatpush.lsf.msrb.mxu1 %v516_v61 }
 0x155   : > { %1184 = vmatpush.lsf.msrb.mxu0 %v448_v62  ;;  %1220 = vmatpush.lsf.msrb.mxu1 %v513_v63 }
 0x157   : > { %1185 = vmatpush.lsf.msrb.mxu0 %v445_v2  ;;  %1221 = vmatpush.lsf.msrb.mxu1 %v510_v3 }
 0x158   : > { %v2009_v8 = vpop.f32.mrf.mxu2  ;;  %v2011_v9 = vpop.f32.mrf.mxu3 }
 0x159   : > { %1186 = vmatpush.lsf.msrb.mxu0 %v442_v4  ;;  %1222 = vmatpush.lsf.msrb.mxu1 %v507_v5 }
 0x15b   : > { %1187 = vmatpush.lsf.msrb.mxu0 %v439_v6  ;;  %1223 = vmatpush.lsf.msrb.mxu1 %v504_v7 }
 0x15d   : > { %1188 = vmatpush.lsf.msrb.mxu0 %v436_v10  ;;  %1224 = vmatpush.lsf.msrb.mxu1 %v501_v11 }
 0x15f   : > { %1189 = vmatpush.lsf.msrb.mxu0 %v433_v12  ;;  %1225 = vmatpush.lsf.msrb.mxu1 %v498_v13 }
 0x160   : > { %v2025_v18 = vpop.f32.mrf.mxu2  ;;  %v2027_v19 = vpop.f32.mrf.mxu3 }
 0x161   : > { %1190 = vmatpush.lsf.msrb.mxu0 %v430_v14  ;;  %1226 = vmatpush.lsf.msrb.mxu1 %v495_v15 }
 0x163   : > { %1191 = vmatpush.lsf.msrb.mxu0 %v427_v16  ;;  %1227 = vmatpush.lsf.msrb.mxu1 %v492_v17 }
 0x165   : > { %1192 = vmatpush.lsf.msrb.mxu0 %v424_v20  ;;  %1228 = vmatpush.lsf.msrb.mxu1 %v489_v23 }
 0x167   : > { %1193 = vmatpush.lsf.msrb.mxu0 %v421_v24  ;;  %1229 = vmatpush.lsf.msrb.mxu1 %v486_v27  ;;  %v592_v27 = vadd.f32 %v2025_v18, %v564_v51 }
 0x168   : > { %v2041_v29 = vpop.f32.mrf.mxu2  ;;  %v2043_v30 = vpop.f32.mrf.mxu3 }
 0x169   : > { %1194 = vmatpush.lsf.msrb.mxu0 %v418_v28  ;;  %1230 = vmatpush.lsf.msrb.mxu1 %v483_v31  ;;  %v595_v23 = vadd.f32 %v2041_v29, %v564_v51  ;;  %v660_v24 = vadd.f32 %v2043_v30, %v565_v52  ;;  %v657_v28 = vadd.f32 %v2027_v19, %v565_v52  ;;  %v763_v30 = vld [vmem:[%s1846_s18 + $0x8] sm:$0xff] }
 0x16a   : > { %1195 = vllmr.16.mxu0  ;;  %1231 = vllmr.16.mxu1  ;;  %v589_v31 = vadd.f32 %v2009_v8, %v564_v51  ;;  %v651_v29 = vadd.f32 %v1993_v59, %v565_v52  ;;  %v875_v59 = vld [vmem:[%s1846_s18 + $0x80] sm:$0xff] }
 0x170   : > { %v2045_v25 = vpop.f32.mrf.mxu2  ;;  %v2047_v26 = vpop.f32.mrf.mxu3 }
 0x171   : > { %v598_v17 = vadd.f32 %v2045_v25, %v564_v51  ;;  %v663_v20 = vadd.f32 %v2047_v26, %v565_v52  ;;  %v654_v25 = vadd.f32 %v2011_v9, %v565_v52  ;;  %v586_v26 = vadd.f32 %v1991_v58, %v564_v51  ;;  %v762_v58 = vld [vmem:[%s1846_s18] sm:$0xff] }
 0x178   : > { %v2049_v21 = vpop.f32.mrf.mxu2  ;;  %v2051_v32 = vpop.f32.mrf.mxu3 }
 0x179   : > { %v601_v15 = vadd.f32 %v2049_v21, %v564_v51  ;;  %v666_v16 = vadd.f32 %v2051_v32, %v565_v52  ;;  %v876_v21 = vld [vmem:[%s1846_s18 + $0x88] sm:$0xff] }
 0x180   : > { %v603_v22 = vpop.f32.mrf.mxu2  ;;  %v668_v33 = vpop.f32.mrf.mxu3 }
 0x181   : > { %v604_v13 = vadd.f32 %v603_v22, %v564_v51  ;;  %v669_v14 = vadd.f32 %v668_v33, %v565_v52 }
 0x188   : > { %v606_v34 = vpop.f32.mrf.mxu2  ;;  %v671_v35 = vpop.f32.mrf.mxu3 }
 0x189   : > { %v607_v11 = vadd.f32 %v606_v34, %v564_v51  ;;  %v672_v12 = vadd.f32 %v671_v35, %v565_v52  ;;  %v764_v35 = vld [vmem:[%s1846_s18 + $0x10] sm:$0xff] }
 0x190   : > { %v609_v36 = vpop.f32.mrf.mxu2  ;;  %v674_v37 = vpop.f32.mrf.mxu3 }
 0x191   : > { %v610_v7 = vadd.f32 %v609_v36, %v564_v51  ;;  %v675_v10 = vadd.f32 %v674_v37, %v565_v52  ;;  %v877_v36 = vld [vmem:[%s1846_s18 + $0x90] sm:$0xff] }
 0x198   : > { %v612_v38 = vpop.f32.mrf.mxu2  ;;  %v677_v39 = vpop.f32.mrf.mxu3 }
 0x199   : > { %v613_v5 = vadd.f32 %v612_v38, %v564_v51  ;;  %v678_v6 = vadd.f32 %v677_v39, %v565_v52 }
 0x1a0   : > { %v615_v40 = vpop.f32.mrf.mxu2  ;;  %v680_v41 = vpop.f32.mrf.mxu3 }
 0x1a1   : > { %v616_v3 = vadd.f32 %v615_v40, %v564_v51  ;;  %v681_v4 = vadd.f32 %v680_v41, %v565_v52  ;;  %v765_v41 = vld [vmem:[%s1846_s18 + $0x18] sm:$0xff] }
 0x1a8   : > { %v618_v42 = vpop.f32.mrf.mxu2  ;;  %v683_v43 = vpop.f32.mrf.mxu3 }
 0x1a9   : > { %v619_v1 = vadd.f32 %v618_v42, %v564_v51  ;;  %v684_v2 = vadd.f32 %v683_v43, %v565_v52  ;;  %v878_v42 = vld [vmem:[%s1846_s18 + $0x98] sm:$0xff] }
 0x1b0   : > { %v621_v44 = vpop.f32.mrf.mxu2  ;;  %v686_v45 = vpop.f32.mrf.mxu3 }
 0x1b1   : > { %v622_v63 = vadd.f32 %v621_v44, %v564_v51  ;;  %v687_v0 = vadd.f32 %v686_v45, %v565_v52 }
 0x1b8   : > { %v624_v46 = vpop.f32.mrf.mxu2  ;;  %v689_v47 = vpop.f32.mrf.mxu3 }
 0x1b9   : > { %v625_v61 = vadd.f32 %v624_v46, %v564_v51  ;;  %v690_v62 = vadd.f32 %v689_v47, %v565_v52  ;;  %v766_v47 = vld [vmem:[%s1846_s18 + $0x20] sm:$0xff] }
 0x1c0   : > { %v627_v48 = vpop.f32.mrf.mxu2  ;;  %v692_v49 = vpop.f32.mrf.mxu3 }
 0x1c1   : > { %v628_v57 = vadd.f32 %v627_v48, %v564_v51  ;;  %v693_v60 = vadd.f32 %v692_v49, %v565_v52  ;;  %v879_v48 = vld [vmem:[%s1846_s18 + $0xa0] sm:$0xff] }
 0x1c8   : > { %v630_v53 = vpop.f32.mrf.mxu2  ;;  %v695_v54 = vpop.f32.mrf.mxu3 }
 0x1c9   : > { %v631_v55 = vadd.f32 %v630_v53, %v564_v51  ;;  %v696_v56 = vadd.f32 %v695_v54, %v565_v52  ;;  %v767_v53 = vld [vmem:[%s1846_s18 + $0x28] sm:$0xff] }
 0x1ca   : > { %v880_v54 = vld [vmem:[%s1846_s18 + $0xa8] sm:$0xff] }
 0x1cb   : > { %778 = vmatpush.msra.mxu0 %v631_v55  ;;  %891 = vmatpush.msra.mxu1 %v696_v56 }
 0x1cd   : > { %779 = vmatpush.msra.mxu0 %v628_v57  ;;  %892 = vmatpush.msra.mxu1 %v693_v60 }
 0x1cf   : > { %780 = vmatpush.msra.mxu0 %v625_v61  ;;  %893 = vmatpush.msra.mxu1 %v690_v62  ;;  %v768_v61 = vld [vmem:[%s1846_s18 + $0x30] sm:$0xff] }
 0x1d0   : > { %v881_v62 = vld [vmem:[%s1846_s18 + $0xb0] sm:$0xff] }
 0x1d1   : > { %781 = vmatpush.msra.mxu0 %v622_v63  ;;  %894 = vmatpush.msra.mxu1 %v687_v0 }
 0x1d3   : > { %782 = vmatpush.msra.mxu0 %v619_v1  ;;  %895 = vmatpush.msra.mxu1 %v684_v2 }
 0x1d5   : > { %783 = vmatpush.msra.mxu0 %v616_v3  ;;  %896 = vmatpush.msra.mxu1 %v681_v4  ;;  %v769_v3 = vld [vmem:[%s1846_s18 + $0x38] sm:$0xff] }
 0x1d6   : > { %v882_v4 = vld [vmem:[%s1846_s18 + $0xb8] sm:$0xff] }
 0x1d7   : > { %784 = vmatpush.msra.mxu0 %v613_v5  ;;  %897 = vmatpush.msra.mxu1 %v678_v6 }
 0x1d9   : > { %785 = vmatpush.msra.mxu0 %v610_v7  ;;  %898 = vmatpush.msra.mxu1 %v675_v10 }
 0x1db   : > { %786 = vmatpush.msra.mxu0 %v607_v11  ;;  %899 = vmatpush.msra.mxu1 %v672_v12  ;;  %v770_v11 = vld [vmem:[%s1846_s18 + $0x40] sm:$0xff] }
 0x1dc   : > { %v883_v12 = vld [vmem:[%s1846_s18 + $0xc0] sm:$0xff] }
 0x1dd   : > { %787 = vmatpush.msra.mxu0 %v604_v13  ;;  %900 = vmatpush.msra.mxu1 %v669_v14 }
 0x1df   : > { %788 = vmatpush.msra.mxu0 %v601_v15  ;;  %901 = vmatpush.msra.mxu1 %v666_v16 }
 0x1e1   : > { %789 = vmatpush.msra.mxu0 %v598_v17  ;;  %902 = vmatpush.msra.mxu1 %v663_v20  ;;  %v771_v17 = vld [vmem:[%s1846_s18 + $0x48] sm:$0xff] }
 0x1e2   : > { %v884_v20 = vld [vmem:[%s1846_s18 + $0xc8] sm:$0xff] }
 0x1e3   : > { %790 = vmatpush.msra.mxu0 %v595_v23  ;;  %903 = vmatpush.msra.mxu1 %v660_v24 }
 0x1e5   : > { %791 = vmatpush.msra.mxu0 %v592_v27  ;;  %904 = vmatpush.msra.mxu1 %v657_v28 }
 0x1e7   : > { %792 = vmatpush.msra.mxu0 %v589_v31  ;;  %905 = vmatpush.msra.mxu1 %v654_v25  ;;  %v772_v31 = vld [vmem:[%s1846_s18 + $0x50] sm:$0xff] }
 0x1e8   : > { %v885_v25 = vld [vmem:[%s1846_s18 + $0xd0] sm:$0xff] }
 0x1e9   : > { %793 = vmatpush.msra.mxu0 %v586_v26  ;;  %906 = vmatpush.msra.mxu1 %v651_v29 }
 0x1ea   : > { %1196 = vmatmul.lmr.bf16.vlgmr.msra.gmra.16.mxu0  ;;  %1232 = vmatmul.lmr.bf16.vlgmr.msra.gmra.16.mxu1 }
 0x1f2   : > { %1197 = vmatmul.lmr.bf16.gmra.16.mxu0  ;;  %1233 = vmatmul.lmr.bf16.gmra.16.mxu1 }
 0x1fa   : > { %1198 = vmatmul.lmr.bf16.gmra.16.mxu0  ;;  %1234 = vmatmul.lmr.bf16.gmra.16.mxu1 }
 0x202   : > { %1199 = vmatmul.lmr.bf16.gmra.16.mxu0  ;;  %1235 = vmatmul.lmr.bf16.gmra.16.mxu1 }
 0x20a   : > { %1200 = vmatmul.lmr.bf16.gmra.16.mxu0  ;;  %1236 = vmatmul.lmr.bf16.gmra.16.mxu1 }
 0x212   : > { %1201 = vmatmul.lmr.bf16.gmra.16.mxu0  ;;  %1237 = vmatmul.lmr.bf16.gmra.16.mxu1 }
 0x21a   : > { %1202 = vmatmul.lmr.bf16.gmra.16.mxu0  ;;  %1238 = vmatmul.lmr.bf16.gmra.16.mxu1 }
 0x222   : > { %1203 = vmatmul.lmr.bf16.gmra.16.mxu0  ;;  %1239 = vmatmul.lmr.bf16.gmra.16.mxu1 }
 0x22a   : > { %1204 = vmatmul.lmr.bf16.gmra.16.mxu0  ;;  %1240 = vmatmul.lmr.bf16.gmra.16.mxu1 }
 0x232   : > { %1205 = vmatmul.lmr.bf16.gmra.16.mxu0  ;;  %1241 = vmatmul.lmr.bf16.gmra.16.mxu1 }
 0x23a   : > { %1206 = vmatmul.lmr.bf16.gmra.16.mxu0  ;;  %1242 = vmatmul.lmr.bf16.gmra.16.mxu1 }
 0x242   : > { %1207 = vmatmul.lmr.bf16.gmra.16.mxu0  ;;  %1243 = vmatmul.lmr.bf16.gmra.16.mxu1 }
 0x24a   : > { %1208 = vmatmul.lmr.bf16.gmra.16.mxu0  ;;  %1244 = vmatmul.lmr.bf16.gmra.16.mxu1 }
 0x252   : > { %1209 = vmatmul.lmr.bf16.gmra.16.mxu0  ;;  %1245 = vmatmul.lmr.bf16.gmra.16.mxu1 }
 0x25a   : > { %1210 = vmatmul.lmr.bf16.gmra.16.mxu0  ;;  %1246 = vmatmul.lmr.bf16.gmra.16.mxu1 }
 0x262   : > { %1211 = vmatmul.lmr.bf16.gmra.16.mxu0  ;;  %1247 = vmatmul.lmr.bf16.gmra.16.mxu1 }
 0x267   : > { %v795_v8 = vpop.f32.mrf.mxu0  ;;  %v908_v9 = vpop.f32.mrf.mxu1 }
 0x268   : > { %v843_v18 = vadd.f32 %v795_v8, %v762_v58  ;;  %v956_v19 = vadd.f32 %v908_v9, %v875_v59  ;;  %v773_v8 = vld [vmem:[%s1846_s18 + $0x58] sm:$0xff] }
 0x269   : > { %v886_v9 = vld [vmem:[%s1846_s18 + $0xd8] sm:$0xff] }
 0x26a   : > { %859 = vst [vmem:[%s1846_s18] sm:$0xff] %v843_v18 }
 0x26b   : > { %972 = vst [vmem:[%s1846_s18 + $0x80] sm:$0xff] %v956_v19 }
 0x26f   : > { %v798_v32 = vpop.f32.mrf.mxu0  ;;  %v911_v22 = vpop.f32.mrf.mxu1 }
 0x270   : > { %v844_v33 = vadd.f32 %v798_v32, %v763_v30  ;;  %v957_v34 = vadd.f32 %v911_v22, %v876_v21  ;;  %v774_v32 = vld [vmem:[%s1846_s18 + $0x60] sm:$0xff] }
 0x271   : > { %v887_v22 = vld [vmem:[%s1846_s18 + $0xe0] sm:$0xff] }
 0x272   : > { %860 = vst [vmem:[%s1846_s18 + $0x8] sm:$0xff] %v844_v33 }
 0x273   : > { %973 = vst [vmem:[%s1846_s18 + $0x88] sm:$0xff] %v957_v34 }
 0x277   : > { %v801_v37 = vpop.f32.mrf.mxu0  ;;  %v914_v38 = vpop.f32.mrf.mxu1 }
 0x278   : > { %v845_v39 = vadd.f32 %v801_v37, %v764_v35  ;;  %v958_v40 = vadd.f32 %v914_v38, %v877_v36  ;;  %v775_v37 = vld [vmem:[%s1846_s18 + $0x68] sm:$0xff] }
 0x279   : > { %v888_v38 = vld [vmem:[%s1846_s18 + $0xe8] sm:$0xff] }
 0x27a   : > { %861 = vst [vmem:[%s1846_s18 + $0x10] sm:$0xff] %v845_v39 }
 0x27b   : > { %974 = vst [vmem:[%s1846_s18 + $0x90] sm:$0xff] %v958_v40 }
 0x27f   : > { %v804_v43 = vpop.f32.mrf.mxu0  ;;  %v917_v44 = vpop.f32.mrf.mxu1 }
 0x280   : > { %v846_v45 = vadd.f32 %v804_v43, %v765_v41  ;;  %v959_v46 = vadd.f32 %v917_v44, %v878_v42  ;;  %v776_v43 = vld [vmem:[%s1846_s18 + $0x70] sm:$0xff] }
 0x281   : > { %v889_v44 = vld [vmem:[%s1846_s18 + $0xf0] sm:$0xff] }
 0x282   : > { %862 = vst [vmem:[%s1846_s18 + $0x18] sm:$0xff] %v846_v45 }
 0x283   : > { %975 = vst [vmem:[%s1846_s18 + $0x98] sm:$0xff] %v959_v46 }
 0x287   : > { %v807_v49 = vpop.f32.mrf.mxu0  ;;  %v920_v50 = vpop.f32.mrf.mxu1 }
 0x288   : > { %v847_v51 = vadd.f32 %v807_v49, %v766_v47  ;;  %v960_v52 = vadd.f32 %v920_v50, %v879_v48  ;;  %v777_v49 = vld [vmem:[%s1846_s18 + $0x78] sm:$0xff] }
 0x289   : > { %v890_v50 = vld [vmem:[%s1846_s18 + $0xf8] sm:$0xff] }
 0x28a   : > { %863 = vst [vmem:[%s1846_s18 + $0x20] sm:$0xff] %v847_v51 }
 0x28b   : > { %976 = vst [vmem:[%s1846_s18 + $0xa0] sm:$0xff] %v960_v52 }
 0x28f   : > { %v810_v55 = vpop.f32.mrf.mxu0  ;;  %v923_v56 = vpop.f32.mrf.mxu1 }
 0x290   : > { %v848_v57 = vadd.f32 %v810_v55, %v767_v53  ;;  %v961_v60 = vadd.f32 %v923_v56, %v880_v54 }
 0x292   : > { %864 = vst [vmem:[%s1846_s18 + $0x28] sm:$0xff] %v848_v57 }
 0x293   : > { %977 = vst [vmem:[%s1846_s18 + $0xa8] sm:$0xff] %v961_v60 }
 0x297   : > { %v813_v63 = vpop.f32.mrf.mxu0  ;;  %v926_v0 = vpop.f32.mrf.mxu1 }
 0x298   : > { %v849_v1 = vadd.f32 %v813_v63, %v768_v61  ;;  %v962_v2 = vadd.f32 %v926_v0, %v881_v62 }
 0x29a   : > { %865 = vst [vmem:[%s1846_s18 + $0x30] sm:$0xff] %v849_v1 }
 0x29b   : > { %978 = vst [vmem:[%s1846_s18 + $0xb0] sm:$0xff] %v962_v2 }
 0x29f   : > { %v816_v5 = vpop.f32.mrf.mxu0  ;;  %v929_v6 = vpop.f32.mrf.mxu1 }
 0x2a0   : > { %v850_v7 = vadd.f32 %v816_v5, %v769_v3  ;;  %v963_v10 = vadd.f32 %v929_v6, %v882_v4 }
 0x2a2   : > { %866 = vst [vmem:[%s1846_s18 + $0x38] sm:$0xff] %v850_v7 }
 0x2a3   : > { %979 = vst [vmem:[%s1846_s18 + $0xb8] sm:$0xff] %v963_v10 }
 0x2a7   : > { %v819_v13 = vpop.f32.mrf.mxu0  ;;  %v932_v14 = vpop.f32.mrf.mxu1 }
 0x2a8   : > { %v851_v15 = vadd.f32 %v819_v13, %v770_v11  ;;  %v964_v16 = vadd.f32 %v932_v14, %v883_v12 }
 0x2aa   : > { %867 = vst [vmem:[%s1846_s18 + $0x40] sm:$0xff] %v851_v15 }
 0x2ab   : > { %980 = vst [vmem:[%s1846_s18 + $0xc0] sm:$0xff] %v964_v16 }
 0x2af   : > { %v822_v23 = vpop.f32.mrf.mxu0  ;;  %v935_v24 = vpop.f32.mrf.mxu1 }
 0x2b0   : > { %v852_v27 = vadd.f32 %v822_v23, %v771_v17  ;;  %v965_v28 = vadd.f32 %v935_v24, %v884_v20 }
 0x2b2   : > { %868 = vst [vmem:[%s1846_s18 + $0x48] sm:$0xff] %v852_v27 }
 0x2b3   : > { %981 = vst [vmem:[%s1846_s18 + $0xc8] sm:$0xff] %v965_v28 }
 0x2b7   : > { %v825_v26 = vpop.f32.mrf.mxu0  ;;  %v938_v29 = vpop.f32.mrf.mxu1 }
 0x2b8   : > { %v853_v58 = vadd.f32 %v825_v26, %v772_v31  ;;  %v966_v59 = vadd.f32 %v938_v29, %v885_v25 }
 0x2ba   : > { %869 = vst [vmem:[%s1846_s18 + $0x50] sm:$0xff] %v853_v58 }
 0x2bb   : > { %982 = vst [vmem:[%s1846_s18 + $0xd0] sm:$0xff] %v966_v59 }
 0x2bf   : > { %v828_v18 = vpop.f32.mrf.mxu0  ;;  %v941_v19 = vpop.f32.mrf.mxu1 }
 0x2c0   : > { %v854_v30 = vadd.f32 %v828_v18, %v773_v8  ;;  %v967_v21 = vadd.f32 %v941_v19, %v886_v9 }
 0x2c2   : > { %870 = vst [vmem:[%s1846_s18 + $0x58] sm:$0xff] %v854_v30 }
 0x2c3   : > { %983 = vst [vmem:[%s1846_s18 + $0xd8] sm:$0xff] %v967_v21 }
 0x2c7   : > { %v831_v33 = vpop.f32.mrf.mxu0  ;;  %v944_v34 = vpop.f32.mrf.mxu1 }
 0x2c8   : > { %v855_v35 = vadd.f32 %v831_v33, %v774_v32  ;;  %v968_v36 = vadd.f32 %v944_v34, %v887_v22 }
 0x2ca   : > { %871 = vst [vmem:[%s1846_s18 + $0x60] sm:$0xff] %v855_v35 }
 0x2cb   : > { %984 = vst [vmem:[%s1846_s18 + $0xe0] sm:$0xff] %v968_v36 }
 0x2cf   : > { %v834_v39 = vpop.f32.mrf.mxu0  ;;  %v947_v40 = vpop.f32.mrf.mxu1 }
 0x2d0   : > { %v856_v41 = vadd.f32 %v834_v39, %v775_v37  ;;  %v969_v42 = vadd.f32 %v947_v40, %v888_v38 }
 0x2d2   : > { %872 = vst [vmem:[%s1846_s18 + $0x68] sm:$0xff] %v856_v41 }
 0x2d3   : > { %985 = vst [vmem:[%s1846_s18 + $0xe8] sm:$0xff] %v969_v42 }
 0x2d7   : > { %v837_v45 = vpop.f32.mrf.mxu0  ;;  %v950_v46 = vpop.f32.mrf.mxu1 }
 0x2d8   : > { %v857_v47 = vadd.f32 %v837_v45, %v776_v43  ;;  %v970_v48 = vadd.f32 %v950_v46, %v889_v44 }
 0x2da   : > { %873 = vst [vmem:[%s1846_s18 + $0x70] sm:$0xff] %v857_v47 }
 0x2db   : > { %986 = vst [vmem:[%s1846_s18 + $0xf0] sm:$0xff] %v970_v48 }
 0x2df   : > { %v840_v51 = vpop.f32.mrf.mxu0  ;;  %v953_v52 = vpop.f32.mrf.mxu1 }
 0x2e0   : > { %v858_v53 = vadd.f32 %v840_v51, %v777_v49  ;;  %v971_v54 = vadd.f32 %v953_v52, %v890_v50 }
 0x2e2   : > { %874 = vst [vmem:[%s1846_s18 + $0x78] sm:$0xff] %v858_v53 }
 0x2e3   : > { %987 = vst [vmem:[%s1846_s18 + $0xf8] sm:$0xff] %v971_v54 }
 0x2e4   : > { %1535 = shalt.err (!%p1532_p7)
}
 0x2e5   : > { %s1648_s4 = smov 128   ;;  %s1649_s18 = smov 8  }
 0x2e6   : > { %1262 = dma.vmem_to_hbm [thread:$0]  (%p1752_p6), %s1002_s2, 4096, %s1004_s30, %s989_s11, %s1648_s4, %s1648_s4, %s1649_s18  }
 0x2e7 PF: > { %s2224_s25 = sld [smem:[#allocation15_spill]]  ;;  %p1289_p8 = scmp.ge.s32.totalorder %s1638_s28, 2 }
 0x2e9   : > { %p1279_p9 = pnand %p1289_p8, %p1758_p10 }
 0x2eb   : > { %p1280_p12 = pneg %p1279_p9 }
 0x2ed   : > { %s1018_s7 = sand.u32 1, %s2224_s25  }
 0x2ee   : > { %s1019_s10 = scalar_lea.sflag [#allocation4], %s1018_s7 }
 0x2ef   : > { %1593 = dma.done.wait (%p1280_p12), %s1019_s10, 4096  }
 0x2f0   : > { %1595 = vsyncadd (%p1280_p12), %s1019_s10, 4294963200  ;;  %s23_s28 = sadd.s32 1, %s1638_s28   ;;  %s2226_s15 = smov %s1816_s21 }
 0x2f1   : > { %p20_p13 = scmp.ge.s32.totalorder %s23_s28, 6   ;;  %s2227_s29 = sld [smem:[#allocation19_spill]] }
 0x2f2   : > { %s2228_s16 = sld [smem:[#allocation20_spill]]  ;;  %s2229_s18 = smov %s1602_s19 }
 0x2f3   : > { %s2230_s19 = smov %s1606_s20  ;;  %s2231_s20 = smov %s1813_s17 }
 0x2f4   : > { %s2232_s21 = smov %s1614_s22  ;;  %s2233_s22 = smov %s1618_s23 }
 0x2f5   : > { %s2234_s23 = smov %s2226_s15  ;;  %s2235_s24 = smov %s1630_s26 }
 0x2f6   : > { %s2236_s25 = smov %s1634_s27  ;;  %22 = sbr.rel (!%p20_p13) target bundleno = 17 (0x11), region = 101 }
 0x2f7   : > { %s2237_s26 = smov %s2227_s29 }
 0x2f8   : > { %s2238_s27 = smov %s2228_s16 }
 0x2fb   :  { %1025 = vsyncpa [#allocation3], 1 }
 0x2fc   :  { %1027 = vsyncpa [#allocation3 + $0x1], 1 }
 0x2fd   :  { %1028 = vsyncpa [#allocation6], 1 }
 0x2fe   :  { %1029 = vsyncpa [#allocation9], 1 }
 0x2ff   :  { %1030 = vsyncpa [#allocation4], 1 }
 0x300   :  { %1032 = vsyncpa [#allocation4 + $0x1], 1 }

</bundles_post_ra>
